<compile_context>
chip_gen: v6e
topology: v6e:2x2x1
jax: 0.10.0
libtpu: 0.0.40
codegen_flags: <defaults>
</compile_context>

<pallas_src>
from functools import partial

import jax
import jax.numpy as jnp
from jax.experimental import pallas as pl
from jax.experimental.pallas import tpu as pltpu

LOG_SIG_MAX = 2.0
LOG_SIG_MIN = -20.0


def _round_up(x, m):
    return (x + m - 1) // m * m


def _policy_kernel(x_ref, w1_ref, b1_ref, w2_ref, b2_ref, wht_ref, bht_ref,
                   out_ref, *, num_actions):
    compute_dtype = w1_ref.dtype

    # State arrives f32 straight from HBM; cast to the MXU compute dtype here
    # (avoids a separate XLA cast/pad kernel and an extra HBM round trip).
    x = x_ref[...].astype(compute_dtype)

    # Layer 1 + ReLU (f32 accumulate on the MXU, bias/ReLU in f32 on the VPU).
    h1 = jnp.dot(x, w1_ref[...], preferred_element_type=jnp.float32) + b1_ref[...]
    h1 = jnp.maximum(h1, 0.0).astype(compute_dtype)

    # Layer 2 + ReLU.
    h2 = jnp.dot(h1, w2_ref[...], preferred_element_type=jnp.float32) + b2_ref[...]
    h2 = jnp.maximum(h2, 0.0).astype(compute_dtype)

    # Fused heads, TRANSPOSED output: yt[r, b] with rows [0, A) = mean,
    # rows [A, 2A) = log_std, rows [2A, HEAD_T) = zero padding.
    # Computed as Wh_t @ h2^T via one dot_general (same contraction pattern as
    # q @ k^T in flash attention) so the store is a lane-dense (HEAD_T, TB)
    # slab: unmasked vst and ~16x less HBM writeback than a 128-wide slab.
    yt = jax.lax.dot_general(
        wht_ref[...], h2,
        dimension_numbers=(((1,), (1,)), ((), ())),
        preferred_element_type=jnp.float32,
    ) + bht_ref[...]

    # Clamp only the log_std rows. NOTE: padding rows (>= 2A) also hit the
    # clamp branch — harmless since clip(0) == 0 and the wrapper discards them.
    row = jax.lax.broadcasted_iota(jnp.int32, yt.shape, dimension=0)
    yt = jnp.where(row >= num_actions,
                   jnp.clip(yt, LOG_SIG_MIN, LOG_SIG_MAX), yt)

    out_ref[...] = yt.astype(out_ref.dtype)


def init_params(key, num_inputs, num_actions, hidden_dim):
    """Xavier-uniform (gain=1) weights, zero biases — mirrors weights_init_.

    Weights stored as [in, out] (transposed vs PyTorch's [out, in])."""
    def xavier(k, fan_in, fan_out):
        limit = jnp.sqrt(6.0 / (fan_in + fan_out))
        return jax.random.uniform(k, (fan_in, fan_out), jnp.float32, -limit, limit)

    k1, k2, k3, k4 = jax.random.split(key, 4)
    w1 = xavier(k1, num_inputs, hidden_dim)
    b1 = jnp.zeros((1, hidden_dim), jnp.float32)
    w2 = xavier(k2, hidden_dim, hidden_dim)
    b2 = jnp.zeros((1, hidden_dim), jnp.float32)
    wm = xavier(k3, hidden_dim, num_actions)
    bm = jnp.zeros((1, num_actions), jnp.float32)
    ws = xavier(k4, hidden_dim, num_actions)
    bs = jnp.zeros((1, num_actions), jnp.float32)
    return (w1, b1, w2, b2, wm, bm, ws, bs)


def prepare_params(raw_params, *, compute_dtype=jnp.bfloat16):
    """Pad hidden to a multiple of 128 and fuse the two heads into a single
    TRANSPOSED head matrix Wh_t of shape [round_up(2A, 8), hidden_pad]
    (rows 0..A-1 = mean head, rows A..2A-1 = log_std head, rest zero).
    Zero padding is exact: padded rows/cols contribute 0 to every dot product.
    Weights are cast to compute_dtype (bf16 default); biases stay f32."""
    w1, b1, w2, b2, wm, bm, ws, bs = raw_params
    num_inputs, hidden = w1.shape
    A = wm.shape[1]
    H = _round_up(hidden, 128)
    HEAD_T = _round_up(2 * A, 8)

    w1p = jnp.zeros((num_inputs, H), jnp.float32).at[:, :hidden].set(w1)
    b1p = jnp.zeros((1, H), jnp.float32).at[:, :hidden].set(b1)
    w2p = jnp.zeros((H, H), jnp.float32).at[:hidden, :hidden].set(w2)
    b2p = jnp.zeros((1, H), jnp.float32).at[:, :hidden].set(b2)
    whtp = (jnp.zeros((HEAD_T, H), jnp.float32)
            .at[:A, :hidden].set(wm.T)
            .at[A:2 * A, :hidden].set(ws.T))
    bhtp = (jnp.zeros((HEAD_T, 1), jnp.float32)
            .at[:A, 0].set(bm[0])
            .at[A:2 * A, 0].set(bs[0]))

    cd = compute_dtype
    return (w1p.astype(cd), b1p, w2p.astype(cd), b2p, whtp.astype(cd), bhtp)


def gaussian_policy_forward(state, prepared_params, num_actions, *, tile_b=512):
    """Fused forward pass. state: [B, num_inputs] f32. Returns (mean, log_std) f32."""
    w1, b1, w2, b2, wht, bht = prepared_params
    B, num_inputs = state.shape
    A = num_actions
    H = w1.shape[1]
    HEAD_T = wht.shape[0]
    compute_dtype = w1.dtype

    # Batch tile: multiple of 128 (lane dim of the transposed output slab),
    # capped at the 128-rounded batch. Prefer >= 2 grid steps when B > 128 so
    # the "parallel" batch axis can be split across v7x's two TensorCores.
    TB = min(_round_up(tile_b, 128), _round_up(B, 128))
    if B > 128 and pl.cdiv(B, TB) < 2:
        TB = _round_up(pl.cdiv(B, 2), 128)
    grid = (pl.cdiv(B, TB),)

    itemsize = jnp.dtype(compute_dtype).itemsize
    weight_bytes = (num_inputs * H + H * H + HEAD_T * H) * itemsize
    bias_bytes = (2 * H + HEAD_T) * 4
    # Double-buffered state/output tiles + (conservatively) double-buffered
    # weights + f32 temporaries (h1/h2/head) + headroom.
    io_bytes = 2 * TB * num_inputs * 4 + 2 * HEAD_T * TB * 4
    live_bytes = 3 * TB * H * 4
    vmem_limit = min(64 << 20,
                     2 * (2 * weight_bytes + bias_bytes + io_bytes + live_bytes)
                     + (4 << 20))

    cost = pl.CostEstimate(
        flops=2 * B * (num_inputs * H + H * H + H * HEAD_T),
        transcendentals=0,
        bytes_accessed=int(B * num_inputs * 4          # state in (f32)
                           + weight_bytes + bias_bytes  # params
                           + HEAD_T * B * 4),           # transposed output (f32)
    )

    # Weights/biases: constant index_map -> fetched once, VMEM-resident.
    const = lambda a: pl.BlockSpec(a.shape, lambda i: (0, 0))

    out = pl.pallas_call(
        partial(_policy_kernel, num_actions=A),
        out_shape=jax.ShapeDtypeStruct((HEAD_T, B), jnp.float32),
        grid=grid,
        in_specs=[
            pl.BlockSpec((TB, num_inputs), lambda i: (i, 0)),  # state tile
            const(w1), const(b1),
            const(w2), const(b2),
            const(wht), const(bht),
        ],
        out_specs=pl.BlockSpec((HEAD_T, TB), lambda i: (0, i)),
        compiler_params=pltpu.CompilerParams(
            # Single batch axis, independent per tile. (pltpu.CORE_PARALLEL is
            # the explicit alternative if profiling shows a v7x core idle.)
            dimension_semantics=("parallel",),
            vmem_limit_bytes=int(vmem_limit),
        ),
        cost_estimate=cost,
    )(state, w1, b1, w2, b2, wht, bht)

    # Layout plumbing only: slice the two heads out of the (HEAD_T, B) slab.
    mean = out[:A, :].T
    log_std = out[A:2 * A, :].T
    return mean, log_std


def _reference_forward(state, raw_params):
    w1, b1, w2, b2, wm, bm, ws, bs = raw_params
    h1 = jnp.maximum(state @ w1 + b1, 0.0)
    h2 = jnp.maximum(h1 @ w2 + b2, 0.0)
    mean = h2 @ wm + bm
    log_std = jnp.clip(h2 @ ws + bs, LOG_SIG_MIN, LOG_SIG_MAX)
    return mean, log_std


if __name__ == "__main__":
    key = jax.random.PRNGKey(0)
    B, num_inputs, num_actions, hidden_dim = 200, 16, 4, 32  # B not a tile multiple

    k_state, k_params = jax.random.split(key)
    state = jax.random.normal(k_state, (B, num_inputs), jnp.float32)
    raw_params = init_params(k_params, num_inputs, num_actions, hidden_dim)
    ref_mean, ref_log_std = _reference_forward(state, raw_params)

    # --- f32 path (exact check; exercises 2-step grid + ragged last block) ---
    params_f32 = prepare_params(raw_params, compute_dtype=jnp.float32)
    mean, log_std = gaussian_policy_forward(state, params_f32, num_actions)
    jax.block_until_ready((mean, log_std))

    assert mean.shape == (B, num_actions) and log_std.shape == (B, num_actions)
    assert jnp.allclose(mean, ref_mean, atol=1e-5, rtol=1e-5)
    assert jnp.allclose(log_std, ref_log_std, atol=1e-5, rtol=1e-5)
    assert jnp.all(log_std >= LOG_SIG_MIN) and jnp.all(log_std <= LOG_SIG_MAX)

    # --- small batch (TB > B, single ragged block) ---
    state_s = state[:48]
    ref_mean_s, ref_log_std_s = _reference_forward(state_s, raw_params)
    mean_s, log_std_s = gaussian_policy_forward(state_s, params_f32, num_actions)
    jax.block_until_ready((mean_s, log_std_s))
    assert mean_s.shape == (48, num_actions)
    assert jnp.allclose(mean_s, ref_mean_s, atol=1e-5, rtol=1e-5)
    assert jnp.allclose(log_std_s, ref_log_std_s, atol=1e-5, rtol=1e-5)

    # --- bf16 weights/activations, f32 accumulation (default / fast path) ---
    params_bf16 = prepare_params(raw_params)  # compute_dtype defaults to bf16
    mean_bf, log_std_bf = gaussian_policy_forward(state, params_bf16, num_actions)
    jax.block_until_ready((mean_bf, log_std_bf))

    assert mean_bf.shape == (B, num_actions) and log_std_bf.shape == (B, num_actions)
    assert jnp.allclose(mean_bf, ref_mean, atol=1e-1, rtol=1e-1)
    assert jnp.allclose(log_std_bf, ref_log_std, atol=1e-1, rtol=1e-1)
    assert jnp.all(log_std_bf >= LOG_SIG_MIN) and jnp.all(log_std_bf <= LOG_SIG_MAX)

    print("KERNEL_OK")
</pallas_src>

<mosaic_0001>
module attributes {stable_mosaic.version = 11 : i64} {
  func.func @_policy_kernel(%arg0: i32, %arg1: memref<128x16xf32, #tpu.memory_space<vmem>>, %arg2: memref<16x128xf32, #tpu.memory_space<vmem>>, %arg3: memref<1x128xf32, #tpu.memory_space<vmem>>, %arg4: memref<128x128xf32, #tpu.memory_space<vmem>>, %arg5: memref<1x128xf32, #tpu.memory_space<vmem>>, %arg6: memref<8x128xf32, #tpu.memory_space<vmem>>, %arg7: memref<8x1xf32, #tpu.memory_space<vmem>>, %arg8: memref<8x128xf32, #tpu.memory_space<vmem>>) attributes {dimension_semantics = [#tpu.dimension_semantics<parallel>], iteration_bounds = array<i64: 2>, scalar_prefetch = 0 : i64, scratch_operands = 0 : i64, tpu.core_type = #tpu.core_type<tc>, window_params = [{transform_indices = @transform_0, window_bounds = array<i64: 128, 16>}, {pipeline_mode = #tpu.pipeline_mode<synchronous>, transform_indices = @transform_1, window_bounds = array<i64: 16, 128>}, {pipeline_mode = #tpu.pipeline_mode<synchronous>, transform_indices = @transform_2, window_bounds = array<i64: 1, 128>}, {pipeline_mode = #tpu.pipeline_mode<synchronous>, transform_indices = @transform_3, window_bounds = array<i64: 128, 128>}, {pipeline_mode = #tpu.pipeline_mode<synchronous>, transform_indices = @transform_4, window_bounds = array<i64: 1, 128>}, {pipeline_mode = #tpu.pipeline_mode<synchronous>, transform_indices = @transform_5, window_bounds = array<i64: 8, 128>}, {pipeline_mode = #tpu.pipeline_mode<synchronous>, transform_indices = @transform_6, window_bounds = array<i64: 8, 1>}, {transform_indices = @transform_7, window_bounds = array<i64: 8, 128>}]} {
    %c0 = arith.constant 0 : index
    %c0_0 = arith.constant 0 : index
    %0 = vector.load %arg1[%c0, %c0_0] : memref<128x16xf32, #tpu.memory_space<vmem>>, vector<128x16xf32>
    %c0_1 = arith.constant 0 : index
    %c0_2 = arith.constant 0 : index
    %1 = vector.load %arg2[%c0_1, %c0_2] : memref<16x128xf32, #tpu.memory_space<vmem>>, vector<16x128xf32>
    %cst = arith.constant dense<0.000000e+00> : vector<128x128xf32>
    %2 = tpu.matmul %0, %1, %cst {dimension_numbers = #tpu.dot_dimension_numbers<[1], [0], [0], [1], [0, 0, 1, 1], [], []>} : vector<128x16xf32>, vector<16x128xf32>, vector<128x128xf32> -> vector<128x128xf32>
    %c0_3 = arith.constant 0 : index
    %c0_4 = arith.constant 0 : index
    %3 = vector.load %arg3[%c0_3, %c0_4] : memref<1x128xf32, #tpu.memory_space<vmem>>, vector<1x128xf32>
    %4 = vector.broadcast %3 : vector<1x128xf32> to vector<128x128xf32>
    %5 = arith.addf %2, %4 : vector<128x128xf32>
    %cst_5 = arith.constant 0.000000e+00 : f32
    %6 = vector.broadcast %cst_5 : f32 to vector<128x128xf32>
    %7 = arith.maximumf %5, %6 : vector<128x128xf32>
    %c0_6 = arith.constant 0 : index
    %c0_7 = arith.constant 0 : index
    %8 = vector.load %arg4[%c0_6, %c0_7] : memref<128x128xf32, #tpu.memory_space<vmem>>, vector<128x128xf32>
    %cst_8 = arith.constant dense<0.000000e+00> : vector<128x128xf32>
    %9 = tpu.matmul %7, %8, %cst_8 {dimension_numbers = #tpu.dot_dimension_numbers<[1], [0], [0], [1], [0, 0, 1, 1], [], []>} : vector<128x128xf32>, vector<128x128xf32>, vector<128x128xf32> -> vector<128x128xf32>
    %c0_9 = arith.constant 0 : index
    %c0_10 = arith.constant 0 : index
    %10 = vector.load %arg5[%c0_9, %c0_10] : memref<1x128xf32, #tpu.memory_space<vmem>>, vector<1x128xf32>
    %11 = vector.broadcast %10 : vector<1x128xf32> to vector<128x128xf32>
    %12 = arith.addf %9, %11 : vector<128x128xf32>
    %cst_11 = arith.constant 0.000000e+00 : f32
    %13 = vector.broadcast %cst_11 : f32 to vector<128x128xf32>
    %14 = arith.maximumf %12, %13 : vector<128x128xf32>
    %c0_12 = arith.constant 0 : index
    %c0_13 = arith.constant 0 : index
    %15 = vector.load %arg6[%c0_12, %c0_13] : memref<8x128xf32, #tpu.memory_space<vmem>>, vector<8x128xf32>
    %cst_14 = arith.constant dense<0.000000e+00> : vector<8x128xf32>
    %16 = tpu.matmul %15, %14, %cst_14 {dimension_numbers = #tpu.dot_dimension_numbers<[1], [1], [0], [0], [0, 0, 1, 0], [], []>} : vector<8x128xf32>, vector<128x128xf32>, vector<8x128xf32> -> vector<8x128xf32>
    %c0_15 = arith.constant 0 : index
    %c0_16 = arith.constant 0 : index
    %17 = vector.load %arg7[%c0_15, %c0_16] : memref<8x1xf32, #tpu.memory_space<vmem>>, vector<8x1xf32>
    %18 = vector.broadcast %17 : vector<8x1xf32> to vector<8x128xf32>
    %19 = arith.addf %16, %18 : vector<8x128xf32>
    %20 = tpu.iota {dimensions = array<i32: 0>} : vector<8x128xi32>
    %c4_i32 = arith.constant 4 : i32
    %21 = vector.broadcast %c4_i32 : i32 to vector<8x128xi32>
    %22 = arith.cmpi sge, %20, %21 : vector<8x128xi32>
    %cst_17 = arith.constant -2.000000e+01 : f32
    %cst_18 = arith.constant 2.000000e+00 : f32
    %23 = vector.broadcast %cst_17 : f32 to vector<8x128xf32>
    %24 = arith.maximumf %23, %19 : vector<8x128xf32>
    %25 = vector.broadcast %cst_18 : f32 to vector<8x128xf32>
    %26 = arith.minimumf %25, %24 : vector<8x128xf32>
    %27 = arith.select %22, %26, %19 : vector<8x128xi1>, vector<8x128xf32>
    %c0_19 = arith.constant 0 : index
    %c0_20 = arith.constant 0 : index
    %28 = vector.load %arg8[%c0_19, %c0_20] : memref<8x128xf32, #tpu.memory_space<vmem>>, vector<8x128xf32>
    tpu.vector_store %arg8[%c0_19, %c0_20], %27 {strides = array<i32>} : memref<8x128xf32, #tpu.memory_space<vmem>>, vector<8x128xf32>,
    return
  }
  func.func @transform_0(%arg0: i32) -> (i32, i32) {
    %c0_i32 = arith.constant 0 : i32
    %c0_i32_0 = arith.constant 0 : i32
    return %arg0, %c0_i32 : i32, i32
  }
  func.func @transform_1(%arg0: i32) -> (i32, i32) {
    %c0_i32 = arith.constant 0 : i32
    %c0_i32_0 = arith.constant 0 : i32
    %c0_i32_1 = arith.constant 0 : i32
    return %c0_i32, %c0_i32_0 : i32, i32
  }
  func.func @transform_2(%arg0: i32) -> (i32, i32) {
    %c0_i32 = arith.constant 0 : i32
    %c0_i32_0 = arith.constant 0 : i32
    %c0_i32_1 = arith.constant 0 : i32
    return %c0_i32, %c0_i32_0 : i32, i32
  }
  func.func @transform_3(%arg0: i32) -> (i32, i32) {
    %c0_i32 = arith.constant 0 : i32
    %c0_i32_0 = arith.constant 0 : i32
    %c0_i32_1 = arith.constant 0 : i32
    return %c0_i32, %c0_i32_0 : i32, i32
  }
  func.func @transform_4(%arg0: i32) -> (i32, i32) {
    %c0_i32 = arith.constant 0 : i32
    %c0_i32_0 = arith.constant 0 : i32
    %c0_i32_1 = arith.constant 0 : i32
    return %c0_i32, %c0_i32_0 : i32, i32
  }
  func.func @transform_5(%arg0: i32) -> (i32, i32) {
    %c0_i32 = arith.constant 0 : i32
    %c0_i32_0 = arith.constant 0 : i32
    %c0_i32_1 = arith.constant 0 : i32
    return %c0_i32, %c0_i32_0 : i32, i32
  }
  func.func @transform_6(%arg0: i32) -> (i32, i32) {
    %c0_i32 = arith.constant 0 : i32
    %c0_i32_0 = arith.constant 0 : i32
    %c0_i32_1 = arith.constant 0 : i32
    return %c0_i32, %c0_i32_0 : i32, i32
  }
  func.func @transform_7(%arg0: i32) -> (i32, i32) {
    %c0_i32 = arith.constant 0 : i32
    %c0_i32_0 = arith.constant 0 : i32
    return %c0_i32, %arg0 : i32, i32
  }
}

</mosaic_0001>

<bundles_post_ra>
// kernel: tpu_custom_call.1
= control target key start
LH: loop header
LB: loop body
LE: loop exit
PB: predicated region body
PF: predicated region fallthrough
CT: control target
= control target key end

     0   :  { %12 = vsyncpa [#allocation3], 0  ;;  %s1457_s0 = inlined_call_operand.vmem [shape: f32[200,16], index: 0, kind: input, shape index: {}]   ;;  %s1458_s1 = inlined_call_operand.vmem [shape: f32[16,128], index: 1, kind: input, shape index: {}]   ;;  %s1459_s2 = inlined_call_operand.vmem [shape: f32[1,128], index: 2, kind: input, shape index: {}]   ;;  %s1460_s3 = inlined_call_operand.vmem [shape: f32[128,128], index: 3, kind: input, shape index: {}]   ;;  %s1461_s4 = inlined_call_operand.vmem [shape: f32[1,128], index: 4, kind: input, shape index: {}]   ;;  %s1462_s5 = inlined_call_operand.vmem [shape: f32[8,128], index: 5, kind: input, shape index: {}]   ;;  %s1463_s6 = inlined_call_operand.vmem [shape: f32[8,1], index: 6, kind: input, shape index: {}]   ;;  %s1464_s7 = inlined_call_operand.hbm [shape: f32[8,200], index: 7, kind: output, shape index: {}]  }
   0x1   :  { %14 = vsyncpa [#allocation3 + $0x1], 0  ;;  %s1239_s24 = smov 0   ;;  %s1241_s25 = smov 0  }
   0x2   :  { %s1243_s26 = smov 0   ;;  %s1245_s27 = smov 0  }
   0x3 LB: > { %s1260_s28 = sadd.s32 4294967295, %s1193_s27   ;;  %s875_s29 = sadd.s32 4294967294, %s1193_s27   ;;  %s1193_s27 = sphi %s1245_s27, %s1470_s27   ;;  %s1189_s26 = sphi %s1243_s26, %s1469_s26   ;;  %s1185_s25 = sphi %s1241_s25, %s1468_s25   ;;  %s1181_s24 = sphi %s1239_s24, %s1467_s24  }
   0x4   : > { %s1264_s30 = sadd.s32 1, %s1193_s27   ;;  %s179_s8 = sadd.s32 1, %s1189_s26 }
   0x5   : > { %s176_s9 = ssub.s32 %s1193_s27, %s1264_s30  ;;  %p189_p0 = scmp.ne.s32.totalorder %s1189_s26, %s1185_s25 }
   0x6   : > { %p177_p1 = scmp.eq.s32.totalorder %s176_s9, 0  ;;  %p190_p2 = scmp.eq.s32.totalorder %s1260_s28, 1 }
   0x7   : > { %p195_p3 = scmp.ne.s32.totalorder %s1185_s25, %s1181_s24  ;;  %p196_p4 = scmp.eq.s32.totalorder %s875_s29, 1 }
   0x8   : > { %s1275_s10 = scalar_select %p177_p1, %s1189_s26, %s179_s8  }
   0x9   : > { %p1277_p5 = por %p190_p2, %p189_p0  ;;  %p1281_p6 = por %p196_p4, %p195_p3 }
   0xa   : > { %p878_p7 = scmp.ge.s32.totalorder %s1193_s27, 1  ;;  %p249_p8 = scmp.lt.s32.totalorder %s1193_s27, 3 }
   0xc   : > { %p250_p9 = pnand %p878_p7, %p249_p8 }
   0xd   : > { %s880_s17 = sshll.u32 (!%p250_p9), %s1260_s28, 4  ;;  %s282_s21 = sand.u32 (!%p250_p9), 1, %s1185_s25  }
   0xe   : > { %253 = sbr.rel (%p250_p9) target bundleno = 725 (0x2d5), region = 48  ;;  %p290_p10 = scmp.lt.s32.totalorder (!%p250_p9), %s880_s17, 24 }
   0xf   : > { %s879_s22 = sshll.u32 (!%p250_p9), %s282_s21, 3  ;;  %s901_s29 = sshll.u32 (!%p250_p9), %s1260_s28, 7 }
  0x10   : > { %s284_s8 = scalar_lea.vmem (!%p250_p9), [#allocation2], %s879_s22  ;;  %s1422_s14 = scalar_lea.hbm (!%p250_p9), %s1464_s7, %s901_s29 }
  0x11   : > { %s816_s9 = sshll.u32 (!%p250_p9), %s284_s8, 4  ;;  %s803_s15 = scalar_lea.sflag (!%p250_p9), [#allocation3], %s282_s21  ;;  %s817_s9 = int_to_ptr.vmem [resolvable:$true] %s816_s9 }
  0x12   : > { %s1133_s16 = scalar_lea.vmem (!%p250_p9), %s817_s9, 128 }
  0x13   : > { %v316_v0 = vld [vmem:[%s1458_s1 + $0x8] sm:$0xff]  ;;  %v315_v1 = vld [vmem:[%s1458_s1] sm:$0xff]  ;;  %v549_v2 = vld [vmem:[%s1460_s3 + $0x78] sm:$0xff]  ;;  %s1472_s17 = smov (!%p290_p10, %s880_s17), 24  ;;  %vm324_vm0 = vcmask 130048   ;;  %vm1196_vm1 = vmmov 0   ;;  %p1134_p11 = scmp.ne.s32.totalorder %s817_s9, %s1133_s16 }
  0x14   : > { %971 = vmatprep.subr.mxu1 %v316_v0  ;;  %s881_s20 = sshll.u32 %s1472_s17, 3  ;;  %v548_v6 = vld [vmem:[%s1460_s3 + $0x70] sm:$0xff]  ;;  %v547_v8 = vld [vmem:[%s1460_s3 + $0x68] sm:$0xff]  ;;  %v546_v10 = vld [vmem:[%s1460_s3 + $0x60] sm:$0xff]  ;;  %s1198_s17 = smov [#allocation2]  }
  0x15   : > { %972 = vmatpush3.msra.mxu1 %v316_v0  ;;  %s1300_s23 = scalar_lea.vmem %s1457_s0, %s881_s20  ;;  %v545_v12 = vld [vmem:[%s1460_s3 + $0x58] sm:$0xff]  ;;  %v544_v14 = vld [vmem:[%s1460_s3 + $0x50] sm:$0xff]  ;;  %v543_v16 = vld [vmem:[%s1460_s3 + $0x48] sm:$0xff]  ;;  %p1135_p12 = pnand %p1134_p11, %p1277_p5 }
  0x16   : > { %973 = vmatprep.subr.mxu1 %v315_v1  ;;  %v299_v3 = vld [vmem:[%s1300_s23] sm:$0xff]  ;;  %v300_v4 = vld [vmem:[%s1300_s23 + $0x8] sm:$0xff]  ;;  %v301_v5 = vld [vmem:[%s1300_s23 + $0x10] sm:$0xff]  ;;  %s1137_s28 = sshll.u32 %s1198_s17, 4  ;;  %s1138_s28 = int_to_ptr.vmem [resolvable:$false] %s1137_s28 }
  0x17   : > { %974 = vmatpush3.msra.mxu1 %v315_v1  ;;  %975 = vmatprep.mubr.msk.f32.mxu1 %vm324_vm0, %v299_v3  ;;  %v302_v7 = vld [vmem:[%s1300_s23 + $0x18] sm:$0xff]  ;;  %v303_v9 = vld [vmem:[%s1300_s23 + $0x20] sm:$0xff]  ;;  %v304_v11 = vld [vmem:[%s1300_s23 + $0x28] sm:$0xff]  ;;  %p1136_p13 = pneg %p1135_p12  ;;  %s1139_s18 = scalar_lea.vmem %s1138_s28, 256 }
  0x18   : > { %999 = vmatprep.subr.mxu1 %v549_v2  ;;  %976 = vmatmul.mubr.msk.f32.vlgmr.msra.gmra.mxu1 %vm324_vm0, %v300_v4  ;;  %v305_v13 = vld [vmem:[%s1300_s23 + $0x30] sm:$0xff]  ;;  %v306_v15 = vld [vmem:[%s1300_s23 + $0x38] sm:$0xff]  ;;  %v307_v17 = vld [vmem:[%s1300_s23 + $0x40] sm:$0xff]  ;;  %p1140_p0 = scmp.lt.s32.totalorder %s817_s9, %s1138_s28  ;;  %p1141_p1 = scmp.lt.s32.totalorder %s1139_s18, %s1133_s16 }
  0x19   : > { %978 = vmatprep.mubr.msk.f32.mxu1 %vm324_vm0, %v301_v5  ;;  %1000 = vmatpush3.msra.mxu1 %v549_v2  ;;  %v542_v18 = vld [vmem:[%s1460_s3 + $0x40] sm:$0xff]  ;;  %v308_v19 = vld [vmem:[%s1300_s23 + $0x48] sm:$0xff]  ;;  %v541_v20 = vld [vmem:[%s1460_s3 + $0x38] sm:$0xff] }
  0x1a   : > { %1001 = vmatprep.subr.mxu1 %v548_v6  ;;  %v309_v21 = vld [vmem:[%s1300_s23 + $0x50] sm:$0xff]  ;;  %v310_v23 = vld [vmem:[%s1300_s23 + $0x58] sm:$0xff]  ;;  %v539_v24 = vld [vmem:[%s1460_s3 + $0x28] sm:$0xff]  ;;  %p1142_p2 = por %p1141_p1, %p1140_p0 }
  0x1b   : > { %1002 = vmatpush3.msra.mxu1 %v548_v6  ;;  %v540_v22 = vld [vmem:[%s1460_s3 + $0x30] sm:$0xff]  ;;  %v311_v25 = vld [vmem:[%s1300_s23 + $0x60] sm:$0xff]  ;;  %v312_v27 = vld [vmem:[%s1300_s23 + $0x68] sm:$0xff] }
  0x1c   : > { %979 = vmatmul.mubr.msk.f32.gmra.mxu1 %vm324_vm0, %v302_v7  ;;  %1003 = vmatprep.subr.mxu1 %v547_v8  ;;  %v538_v26 = vld [vmem:[%s1460_s3 + $0x20] sm:$0xff]  ;;  %v537_v28 = vld [vmem:[%s1460_s3 + $0x18] sm:$0xff]  ;;  %v313_v29 = vld [vmem:[%s1300_s23 + $0x70] sm:$0xff]  ;;  %p1143_p3 = pnand %p1142_p2, %p1136_p13 }
  0x1d   : > { %981 = vmatprep.mubr.msk.f32.mxu1 %vm324_vm0, %v303_v9  ;;  %1004 = vmatpush3.msra.mxu1 %v547_v8  ;;  %v314_v30 = vld [vmem:[%s1300_s23 + $0x78] sm:$0xff]  ;;  %v536_v31 = vld [vmem:[%s1460_s3 + $0x10] sm:$0xff]  ;;  %v535_v32 = vld [vmem:[%s1460_s3 + $0x8] sm:$0xff] }
  0x1e   : > { %1005 = vmatprep.subr.mxu1 %v546_v10  ;;  %v534_v33 = vld [vmem:[%s1460_s3] sm:$0xff] }
  0x1f   : > { %1006 = vmatpush3.msra.mxu1 %v546_v10  ;;  %v882_v34 = vld [vmem:[%s1459_s2] ss:$0 sm:$0xff] }
  0x20   : > { %982 = vmatmul.mubr.msk.f32.gmra.mxu1 %vm324_vm0, %v304_v11  ;;  %1007 = vmatprep.subr.mxu1 %v545_v12 }
  0x21   : > { %984 = vmatprep.mubr.msk.f32.mxu1 %vm324_vm0, %v305_v13  ;;  %1008 = vmatpush3.msra.mxu1 %v545_v12 }
  0x22   : > { %1009 = vmatprep.subr.mxu1 %v544_v14 }
  0x23   : > { %1010 = vmatpush3.msra.mxu1 %v544_v14 }
  0x24   : > { %985 = vmatmul.mubr.msk.f32.gmra.mxu1 %vm324_vm0, %v306_v15  ;;  %1011 = vmatprep.subr.mxu1 %v543_v16 }
  0x25   : > { %987 = vmatprep.mubr.msk.f32.mxu1 %vm324_vm0, %v307_v17  ;;  %1012 = vmatpush3.msra.mxu1 %v543_v16 }
  0x26   : > { %1013 = vmatprep.subr.mxu1 %v542_v18 }
  0x27   : > { %1014 = vmatpush3.msra.mxu1 %v542_v18 }
  0x28   : > { %988 = vmatmul.mubr.msk.f32.gmra.mxu1 %vm324_vm0, %v308_v19  ;;  %1015 = vmatprep.subr.mxu1 %v541_v20  ;;  %v1195_v19 = vmov 0.0  }
  0x29   : > { %990 = vmatprep.mubr.msk.f32.mxu1 %vm324_vm0, %v309_v21  ;;  %1016 = vmatpush3.msra.mxu1 %v541_v20  ;;  %v719_v20 = vld [vmem:[%s1463_s6] sm:$0xff]  ;;  %v1197_v21 = vmov 0  }
  0x2a   : > { %1017 = vmatprep.subr.mxu1 %v540_v22  ;;  %1055 = vmatprep.subr.mxu0 %v1195_v19 }
  0x2b   : > { %1018 = vmatpush3.msra.mxu1 %v540_v22  ;;  %1087 = vmatprep.mubr.msk.f32.mxu0 %vm1196_vm1, %v1195_v19 }
  0x2c   : > { %991 = vmatmul.mubr.msk.f32.gmra.mxu1 %vm324_vm0, %v310_v23  ;;  %1019 = vmatprep.subr.mxu1 %v539_v24 }
  0x2d   : > { %993 = vmatprep.mubr.msk.f32.mxu1 %vm324_vm0, %v311_v25  ;;  %1020 = vmatpush3.msra.mxu1 %v539_v24 }
  0x2e   : > { %1021 = vmatprep.subr.mxu1 %v538_v26  ;;  %1132 = vset.pattern.permute.xlu0 %v1197_v21 }
  0x2f   : > { %1022 = vmatpush3.msra.mxu1 %v538_v26  ;;  %722 = vperm.xlu0 %1132, %v719_v20  }
  0x30   : > { %994 = vmatmul.mubr.msk.f32.gmra.mxu1 %vm324_vm0, %v312_v27  ;;  %1023 = vmatprep.subr.mxu1 %v537_v28 }
  0x31   : > { %996 = vmatprep.mubr.msk.f32.mxu1 %vm324_vm0, %v313_v29  ;;  %1024 = vmatpush3.msra.mxu1 %v537_v28 }
  0x32   : > { %1025 = vmatprep.subr.mxu1 %v536_v31 }
  0x33   : > { %1026 = vmatpush3.msra.mxu1 %v536_v31 }
  0x34   : > { %997 = vmatmul.mubr.msk.f32.gmra.mxu1 %vm324_vm0, %v314_v30  ;;  %1027 = vmatprep.subr.mxu1 %v535_v32 }
  0x35   : > { %1028 = vmatpush3.msra.mxu1 %v535_v32 }
  0x36   : > { %1029 = vmatprep.subr.mxu1 %v534_v33 }
  0x37   : > { %1030 = vmatpush3.msra.mxu1 %v534_v33 }
  0xd8   : > { %v977_v35 = vpop.f32.mrf.mxu1 }
  0xd9   : > { %v445_v36 = vadd.f32 %v977_v35, %v882_v34 }
  0xda   : > { %v439_v37 = vpop.f32.mrf.mxu1 }
  0xdb   : > { %v440_v38 = vadd.f32 %v882_v34, %v439_v37  ;;  %v519_v41 = vmax.f32 %v445_v36, 0.0  ;;  %v899_v36 = vld [vmem:[%s1461_s4] ss:$0 sm:$0xff] }
  0xdc   : > { %v980_v39 = vpop.f32.mrf.mxu1 }
  0xdd   : > { %v518_v40 = vmax.f32 %v440_v38, 0.0  ;;  %v455_v42 = vadd.f32 %v980_v39, %v882_v34 }
  0xde   : > { %v449_v43 = vpop.f32.mrf.mxu1 }
  0xdf   : > { %v450_v44 = vadd.f32 %v882_v34, %v449_v43  ;;  %1031 = vmatprep.mubr.f32.mxu1 %v518_v40  ;;  %v521_v47 = vmax.f32 %v455_v42, 0.0 }
  0xe0   : > { %v983_v45 = vpop.f32.mrf.mxu1  ;;  %1032 = vmatmul.mubr.f32.vlgmr.msra.gmra.mxu1 %v519_v41 }
  0xe1   : > { %v520_v46 = vmax.f32 %v450_v44, 0.0  ;;  %v465_v48 = vadd.f32 %v983_v45, %v882_v34 }
  0xe2   : > { %v459_v49 = vpop.f32.mrf.mxu1 }
  0xe3   : > { %v460_v50 = vadd.f32 %v882_v34, %v459_v49  ;;  %1034 = vmatprep.mubr.f32.mxu1 %v520_v46  ;;  %v523_v53 = vmax.f32 %v465_v48, 0.0 }
  0xe4   : > { %v986_v51 = vpop.f32.mrf.mxu1  ;;  %1035 = vmatmul.mubr.f32.gmra.mxu1 %v521_v47 }
  0xe5   : > { %v522_v52 = vmax.f32 %v460_v50, 0.0  ;;  %v475_v54 = vadd.f32 %v986_v51, %v882_v34 }
  0xe6   : > { %v469_v55 = vpop.f32.mrf.mxu1 }
  0xe7   : > { %v470_v56 = vadd.f32 %v882_v34, %v469_v55  ;;  %1037 = vmatprep.mubr.f32.mxu1 %v522_v52  ;;  %v525_v59 = vmax.f32 %v475_v54, 0.0 }
  0xe8   : > { %v989_v57 = vpop.f32.mrf.mxu1  ;;  %1038 = vmatmul.mubr.f32.gmra.mxu1 %v523_v53 }
  0xe9   : > { %v524_v58 = vmax.f32 %v470_v56, 0.0  ;;  %v485_v60 = vadd.f32 %v989_v57, %v882_v34 }
  0xea   : > { %v479_v61 = vpop.f32.mrf.mxu1 }
  0xeb   : > { %v480_v62 = vadd.f32 %v882_v34, %v479_v61  ;;  %1040 = vmatprep.mubr.f32.mxu1 %v524_v58  ;;  %v527_v1 = vmax.f32 %v485_v60, 0.0 }
  0xec   : > { %v992_v63 = vpop.f32.mrf.mxu1  ;;  %1041 = vmatmul.mubr.f32.gmra.mxu1 %v525_v59 }
  0xed   : > { %v526_v0 = vmax.f32 %v480_v62, 0.0  ;;  %v495_v2 = vadd.f32 %v992_v63, %v882_v34 }
  0xee   : > { %v489_v3 = vpop.f32.mrf.mxu1 }
  0xef   : > { %v490_v4 = vadd.f32 %v882_v34, %v489_v3  ;;  %1043 = vmatprep.mubr.f32.mxu1 %v526_v0  ;;  %v529_v7 = vmax.f32 %v495_v2, 0.0 }
  0xf0   : > { %v995_v5 = vpop.f32.mrf.mxu1  ;;  %1044 = vmatmul.mubr.f32.gmra.mxu1 %v527_v1 }
  0xf1   : > { %v528_v6 = vmax.f32 %v490_v4, 0.0  ;;  %v505_v8 = vadd.f32 %v995_v5, %v882_v34 }
  0xf2   : > { %v499_v9 = vpop.f32.mrf.mxu1 }
  0xf3   : > { %v500_v10 = vadd.f32 %v882_v34, %v499_v9  ;;  %1046 = vmatprep.mubr.f32.mxu1 %v528_v6  ;;  %v531_v13 = vmax.f32 %v505_v8, 0.0  ;;  %v795_v8 = vlaneseq  ;;  %v723_v9 = vpop.permute.xlu0 %722 }
  0xf4   : > { %v998_v11 = vpop.f32.mrf.mxu1  ;;  %1047 = vmatmul.mubr.f32.gmra.mxu1 %v529_v7  ;;  %v718_v7 = vld [vmem:[%s1462_s5] sm:$0xff] }
  0xf5   : > { %v530_v12 = vmax.f32 %v500_v10, 0.0  ;;  %v515_v14 = vadd.f32 %v998_v11, %v882_v34  ;;  %v796_v11 = vshrl.u32 %v795_v8, 7 }
  0xf6   : > { %v509_v15 = vpop.f32.mrf.mxu1 }
  0xf7   : > { %v510_v16 = vadd.f32 %v882_v34, %v509_v15  ;;  %1049 = vmatprep.mubr.f32.mxu1 %v530_v12  ;;  %v533_v18 = vmax.f32 %v515_v14, 0.0  ;;  %vm797_vm2 = vcmp.ge.s32.totalorder %v796_v11, 4 }
  0xf8   : > { %1050 = vmatmul.mubr.f32.gmra.mxu1 %v531_v13 }
  0xf9   : > { %v532_v17 = vmax.f32 %v510_v16, 0.0 }
  0xfb   : > { %1052 = vmatprep.mubr.f32.mxu1 %v532_v17 }
  0xfc   : > { %1053 = vmatmul.mubr.f32.gmra.mxu1 %v533_v18 }
 0x1a0   : > { %v1387_v22 = vpop.f32.mrf.mxu1 }
 0x1a1   : > { %v629_v2 = vadd.f32 %v1387_v22, %v899_v36 }
 0x1a2   : > { %v1389_v23 = vpop.f32.mrf.mxu1 }
 0x1a3   : > { %v703_v4 = vmax.f32 %v629_v2, 0.0  ;;  %v624_v5 = vadd.f32 %v899_v36, %v1389_v23 }
 0x1a4   : > { %v1036_v24 = vpop.f32.mrf.mxu1 }
 0x1a5   : > { %v639_v62 = vadd.f32 %v1036_v24, %v899_v36  ;;  %v702_v6 = vmax.f32 %v624_v5, 0.0 }
 0x1a6   : > { %v1391_v25 = vpop.f32.mrf.mxu1 }
 0x1a7   : > { %v705_v0 = vmax.f32 %v639_v62, 0.0  ;;  %v634_v1 = vadd.f32 %v899_v36, %v1391_v25 }
 0x1a8   : > { %v1039_v26 = vpop.f32.mrf.mxu1 }
 0x1a9   : > { %v649_v58 = vadd.f32 %v1039_v26, %v899_v36  ;;  %v704_v3 = vmax.f32 %v634_v1, 0.0 }
 0x1aa   : > { %v643_v27 = vpop.f32.mrf.mxu1 }
 0x1ab   : > { %v707_v60 = vmax.f32 %v649_v58, 0.0  ;;  %v644_v61 = vadd.f32 %v899_v36, %v643_v27 }
 0x1ac   : > { %v1042_v28 = vpop.f32.mrf.mxu1 }
 0x1ad   : > { %v659_v54 = vadd.f32 %v1042_v28, %v899_v36  ;;  %v706_v63 = vmax.f32 %v644_v61, 0.0 }
 0x1ae   : > { %v653_v29 = vpop.f32.mrf.mxu1 }
 0x1af   : > { %v709_v56 = vmax.f32 %v659_v54, 0.0  ;;  %v654_v57 = vadd.f32 %v899_v36, %v653_v29 }
 0x1b0   : > { %v1045_v30 = vpop.f32.mrf.mxu1 }
 0x1b1   : > { %v669_v50 = vadd.f32 %v1045_v30, %v899_v36  ;;  %v708_v59 = vmax.f32 %v654_v57, 0.0 }
 0x1b2   : > { %v663_v31 = vpop.f32.mrf.mxu1 }
 0x1b3   : > { %v711_v52 = vmax.f32 %v669_v50, 0.0  ;;  %v664_v53 = vadd.f32 %v899_v36, %v663_v31 }
 0x1b4   : > { %v1048_v32 = vpop.f32.mrf.mxu1 }
 0x1b5   : > { %v679_v46 = vadd.f32 %v1048_v32, %v899_v36  ;;  %v710_v55 = vmax.f32 %v664_v53, 0.0 }
 0x1b6   : > { %v673_v33 = vpop.f32.mrf.mxu1 }
 0x1b7   : > { %v713_v48 = vmax.f32 %v679_v46, 0.0  ;;  %v674_v49 = vadd.f32 %v899_v36, %v673_v33 }
 0x1b8   : > { %v1051_v34 = vpop.f32.mrf.mxu1 }
 0x1b9   : > { %v689_v42 = vadd.f32 %v1051_v34, %v899_v36  ;;  %v712_v51 = vmax.f32 %v674_v49, 0.0 }
 0x1ba   : > { %v683_v35 = vpop.f32.mrf.mxu1 }
 0x1bb   : > { %v715_v44 = vmax.f32 %v689_v42, 0.0  ;;  %v684_v45 = vadd.f32 %v899_v36, %v683_v35 }
 0x1bc   : > { %v1054_v37 = vpop.f32.mrf.mxu1 }
 0x1bd   : > { %v699_v38 = vadd.f32 %v1054_v37, %v899_v36  ;;  %v714_v47 = vmax.f32 %v684_v45, 0.0 }
 0x1be   : > { %v693_v39 = vpop.f32.mrf.mxu1 }
 0x1bf   : > { %v717_v40 = vmax.f32 %v699_v38, 0.0  ;;  %v694_v41 = vadd.f32 %v899_v36, %v693_v39 }
 0x1c1   : > { %1056 = vmatpush3.xpose.msra.mxu0 %v717_v40  ;;  %v716_v43 = vmax.f32 %v694_v41, 0.0 }
 0x1c2   : > { %1057 = vmatprep.subr.mxu0 %v1195_v19 }
 0x1c5   : > { %1058 = vmatpush3.xpose.msra.mxu0 %v716_v43 }
 0x1c6   : > { %1059 = vmatprep.subr.mxu0 %v1195_v19 }
 0x1c9   : > { %1060 = vmatpush3.xpose.msra.mxu0 %v715_v44 }
 0x1ca   : > { %1061 = vmatprep.subr.mxu0 %v1195_v19 }
 0x1cd   : > { %1062 = vmatpush3.xpose.msra.mxu0 %v714_v47 }
 0x1ce   : > { %1063 = vmatprep.subr.mxu0 %v1195_v19 }
 0x1d1   : > { %1064 = vmatpush3.xpose.msra.mxu0 %v713_v48 }
 0x1d2   : > { %1065 = vmatprep.subr.mxu0 %v1195_v19 }
 0x1d5   : > { %1066 = vmatpush3.xpose.msra.mxu0 %v712_v51 }
 0x1d6   : > { %1067 = vmatprep.subr.mxu0 %v1195_v19 }
 0x1d9   : > { %1068 = vmatpush3.xpose.msra.mxu0 %v711_v52 }
 0x1da   : > { %1069 = vmatprep.subr.mxu0 %v1195_v19 }
 0x1dd   : > { %1070 = vmatpush3.xpose.msra.mxu0 %v710_v55 }
 0x1de   : > { %1071 = vmatprep.subr.mxu0 %v1195_v19 }
 0x1e1   : > { %1072 = vmatpush3.xpose.msra.mxu0 %v709_v56 }
 0x1e2   : > { %1073 = vmatprep.subr.mxu0 %v1195_v19 }
 0x1e5   : > { %1074 = vmatpush3.xpose.msra.mxu0 %v708_v59 }
 0x1e6   : > { %1075 = vmatprep.subr.mxu0 %v1195_v19 }
 0x1e9   : > { %1076 = vmatpush3.xpose.msra.mxu0 %v707_v60 }
 0x1ea   : > { %1077 = vmatprep.subr.mxu0 %v1195_v19 }
 0x1ed   : > { %1078 = vmatpush3.xpose.msra.mxu0 %v706_v63 }
 0x1ee   : > { %1079 = vmatprep.subr.mxu0 %v1195_v19 }
 0x1f1   : > { %1080 = vmatpush3.xpose.msra.mxu0 %v705_v0 }
 0x1f2   : > { %1081 = vmatprep.subr.mxu0 %v1195_v19 }
 0x1f5   : > { %1082 = vmatpush3.xpose.msra.mxu0 %v704_v3 }
 0x1f6   : > { %1083 = vmatprep.subr.mxu0 %v1195_v19 }
 0x1f9   : > { %1084 = vmatpush3.xpose.msra.mxu0 %v703_v4 }
 0x1fa   : > { %1085 = vmatprep.subr.mxu0 %v1195_v19 }
 0x1fd   : > { %1086 = vmatpush3.xpose.msra.mxu0 %v702_v6 }
 0x200   : > { %1088 = vmatmul.mubr.f32.vlgmr.msra.gmra.mxu0 %v718_v7 }
 0x2c0   : > { %v791_v10 = vpop.f32.mrf.mxu0 }
 0x2c1   : > { %v792_v12 = vadd.f32 %v791_v10, %v723_v9 }
 0x2c2   : > { %v1089_v13 = vpop.f32.mrf.mxu0 }
 0x2c3   : > { %v798_v14 = vmax.f32 %v792_v12, -20.0 }
 0x2c5   : > { %v799_v15 = vmin.f32 %v798_v14, 2.0 }
 0x2c7   : > { %v800_v16 = vsel %vm797_vm2, %v799_v15, %v792_v12 }
 0x2c8   : > { %801 = vst [vmem:[%s284_s8] sm:$0xff] %v800_v16 }
 0x2c9   : > { %1146 = shalt.err (!%p1143_p3)
}
 0x2ca   : > { %s1147_s19 = scalar_lea.hbm %s1422_s14, 128  ;;  %s1151_s22 = scalar_lea.hbm %s1464_s7, 256 }
 0x2cb   : > { %p1148_p4 = scmp.ne.s32.totalorder %s1422_s14, %s1147_s19  ;;  %p1152_p9 = scmp.lt.s32.totalorder %s1422_s14, %s1464_s7 }
 0x2cc   : > { %p1153_p10 = scmp.lt.s32.totalorder %s1151_s22, %s1147_s19 }
 0x2cd   : > { %p1149_p7 = pnand %p1148_p4, %p1277_p5 }
 0x2ce   : > { %p1154_p11 = por %p1153_p10, %p1152_p9 }
 0x2cf   : > { %p1150_p8 = pneg %p1149_p7 }
 0x2d1   : > { %p1155_p12 = pnand %p1154_p11, %p1150_p8 }
 0x2d3   : > { %1158 = shalt.err (!%p1155_p12)
}
 0x2d4   : > { %1090 = dma.vmem_to_hbm [thread:$0]  (%p1277_p5), %s817_s9, 128, %s1422_s14, %s803_s15  }
 0x2d5 PF: > { %p1096_p13 = scmp.ge.s32.totalorder %s1193_s27, 2  ;;  %s828_s13 = sand.u32 1, %s1181_s24  }
 0x2d6   : > { %s829_s23 = scalar_lea.sflag [#allocation3], %s828_s13 }
 0x2d7   : > { %p1093_p0 = pnand %p1096_p13, %p1281_p6 }
 0x2d9   : > { %p1094_p1 = pneg %p1093_p0 }
 0x2db   : > { %1176 = dma.done.wait (%p1094_p1), %s829_s23, 128  }
 0x2dc   : > { %1178 = vsyncadd (%p1094_p1), %s829_s23, 4294967168  ;;  %p17_p2 = scmp.ge.s32.totalorder %s1264_s30, 4   ;;  %s1467_s24 = smov %s1185_s25 }
 0x2dd   : > { %s1468_s25 = smov %s1189_s26  ;;  %s1469_s26 = smov %s1275_s10 }
 0x2de   : > { %s1470_s27 = smov %s1264_s30  ;;  %19 = sbr.rel (!%p17_p2) target bundleno = 3 (0x3), region = 83 }
 0x2e3   :  { %834 = vsyncpa [#allocation3], 1 }
 0x2e4   :  { %836 = vsyncpa [#allocation3 + $0x1], 1 }

</bundles_post_ra>
